<compile_context>
chip_gen: v6e
topology: v6e:2x2x1
jax: 0.10.0
libtpu: 0.0.40
codegen_flags: <defaults>
</compile_context>

<pallas_src>
import functools

import jax
import jax.numpy as jnp
from jax import lax
from jax.experimental import pallas as pl
from jax.experimental.pallas import tpu as pltpu

EPS = 1e-5


# ---------------------------------------------------------------------------
# Fused kernel
# ---------------------------------------------------------------------------
def _cnn_nlp_kernel(x_ref, emb_ref, convw_ref, convb_ref, mask_ref,
                    fc1w_ref, fc1b_ref, fc2w_ref, fc2b_ref,
                    out_ref, *, B, S, fs_max):
    BS = B * S
    # Character embedding: (B*S, W*V) @ block-diag(W*V, C) -> (B*S, C).
    xe = jnp.dot(x_ref[...], emb_ref[...], preferred_element_type=jnp.float32)

    # im2col via sublane rotation: tap t, row p sees xe[(p + t) % (B*S)].
    # Wrapped rows are harmless: they only appear under zero-weight (K-padded)
    # taps or at positions the pooling mask zeroes out.
    taps = [xe] + [pltpu.roll(xe, shift=BS - t, axis=0) for t in range(1, fs_max)]
    lhs = jnp.concatenate(taps, axis=1)                       # (B*S, fs_max*C = 128)

    # ONE fused conv matmul for all branches (BN folded, K- and lane-padded to 128).
    y = jnp.dot(lhs, convw_ref[...], preferred_element_type=jnp.float32) + convb_ref[...]
    y = jnp.maximum(y, 0.0)                                   # ReLU (BN already folded)

    # Masked global max-pool over the per-branch valid positions; multiplying
    # invalid positions to 0 is correct ONLY because y is post-ReLU (>= 0).
    pooled = jnp.max(y.reshape(B, S, -1) * mask_ref[...], axis=1)   # (B, 128)

    # fc1 (+ folded BatchNorm) -> ReLU; lane-dense (B,128)@(128,128).
    h = jnp.dot(pooled, fc1w_ref[...], preferred_element_type=jnp.float32) + fc1b_ref[...]
    h = jnp.maximum(h, 0.0)
    # TODO(synk): dropout implemented as inference-mode identity (p=0.5 only active in training).

    logits = (jnp.dot(h, fc2w_ref[...], preferred_element_type=jnp.float32)
              + fc2b_ref[...])
    logits = logits - jnp.max(logits, axis=1, keepdims=True)
    e = jnp.exp(logits)
    out_ref[...] = e * pl.reciprocal(jnp.sum(e, axis=1, keepdims=True), approx=True)


# ---------------------------------------------------------------------------
# One-time parameter preparation (hoisted out of the per-call forward path):
# BN folding, transposes, K/lane padding, branch merging, pooling mask.
# ---------------------------------------------------------------------------
def prepare_params(p, filter_sizes, word_len, seq_len):
    V, E = p["emb"].shape
    C = word_len * E
    # Block-diagonal embedding so the kernel's first matmul emits (B*S, C).
    emb_blk = jnp.kron(jnp.eye(word_len, dtype=jnp.float32),
                       p["emb"].astype(jnp.float32))          # (W*V, C)

    fs_max = max(filter_sizes)
    Kmax = fs_max * C
    conv_w_cols, conv_b_cols, mask_cols = [], [], []
    for i, fs in enumerate(filter_sizes):
        w, b, bn = p["conv_w"][i], p["conv_b"][i], p["bn"][i]  # bn rows: gamma,beta,mean,var
        scale = bn[0] * lax.rsqrt(bn[3] + EPS)
        # torch Conv1d weight (F, C, fs) -> (fs*C, F), tap-major rows, BN folded.
        wk = jnp.transpose(w, (2, 1, 0)).reshape(fs * C, -1) * scale[None, :]
        # Zero rows neutralize taps t >= fs once all branches share Kmax.
        conv_w_cols.append(jnp.pad(wk, ((0, Kmax - fs * C), (0, 0))))
        conv_b_cols.append((b - bn[2]) * scale + bn[1])
        # Valid conv positions for this branch: p in [0, S - fs].
        valid = (jnp.arange(seq_len) <= (seq_len - fs)).astype(jnp.float32)
        mask_cols.append(jnp.tile(valid[:, None], (1, w.shape[0])))

    conv_w = jnp.concatenate(conv_w_cols, axis=1)             # (Kmax, sumF)
    conv_b = jnp.concatenate(conv_b_cols)                     # (sumF,)
    mask = jnp.concatenate(mask_cols, axis=1)                 # (S, sumF)
    Fsum = conv_w.shape[1]
    Fpad = ((Fsum + 127) // 128) * 128                        # 96 -> 128 lane-dense
    conv_w = jnp.pad(conv_w, ((0, 0), (0, Fpad - Fsum)))      # (Kmax, Fpad)
    conv_b = jnp.pad(conv_b, (0, Fpad - Fsum)).reshape(1, Fpad)
    mask = jnp.pad(mask, ((0, 0), (0, Fpad - Fsum))).reshape(1, seq_len, Fpad)

    bn = p["bn_fc"]
    scale = bn[0] * lax.rsqrt(bn[3] + EPS)
    hidden = p["fc1_w"].shape[0]
    hpad = ((hidden + 127) // 128) * 128                      # 100 -> 128 lane-dense
    fc1w = jnp.pad(p["fc1_w"].T * scale[None, :],
                   ((0, Fpad - Fsum), (0, hpad - hidden)))    # (Fpad, hpad)
    fc1b = jnp.pad((p["fc1_b"] - bn[2]) * scale + bn[1],
                   (0, hpad - hidden)).reshape(1, hpad)
    fc2w = jnp.pad(p["fc2_w"].T, ((0, hpad - hidden), (0, 0)))  # (hpad, num_classes)
    fc2b = p["fc2_b"].reshape(1, -1)
    return {"emb_blk": emb_blk, "conv_w": conv_w, "conv_b": conv_b, "mask": mask,
            "fc1w": fc1w, "fc1b": fc1b, "fc2w": fc2w, "fc2b": fc2b,
            "fs_max": int(fs_max), "C": int(C)}


def cnn_nlp_forward(x, kp):
    B, S, W, V = x.shape
    num_classes = kp["fc2w"].shape[1]
    x2d = x.astype(jnp.float32).reshape(B * S, W * V)         # free flatten
    kernel = functools.partial(_cnn_nlp_kernel, B=B, S=S, fs_max=kp["fs_max"])
    return pl.pallas_call(
        kernel,
        out_shape=jax.ShapeDtypeStruct((B, num_classes), jnp.float32),
        in_specs=[pl.BlockSpec(memory_space=pltpu.MemorySpace.VMEM)] * 9,
        out_specs=pl.BlockSpec(memory_space=pltpu.MemorySpace.VMEM),
    )(x2d, kp["emb_blk"], kp["conv_w"], kp["conv_b"], kp["mask"],
      kp["fc1w"], kp["fc1b"], kp["fc2w"], kp["fc2b"])


# ---------------------------------------------------------------------------
# Deterministic synthetic params (torch layout) + pure-JAX reference forward
# ---------------------------------------------------------------------------
def init_params(key, vocab, embed, word_len, filter_sizes, num_filters,
                num_classes, hidden=100):
    C = embed * word_len
    ks = iter(jax.random.split(key, 40))

    def rnd(shape, scale=0.1):
        return (scale * jax.random.normal(next(ks), shape)).astype(jnp.float32)

    def bn_init(f):
        gamma = 1.0 + rnd((f,), 0.1)
        beta = rnd((f,), 0.1)
        mean = rnd((f,), 0.1)
        var = 0.5 + jnp.abs(rnd((f,), 0.5))
        return jnp.stack([gamma, beta, mean, var], axis=0)    # (4, f)

    return {
        "emb": rnd((vocab, embed), 0.2),                              # CharEmbedding.weight
        "conv_w": [rnd((num_filters[i], C, filter_sizes[i]), 0.1)     # Conv1d (F,C,fs)
                   for i in range(len(filter_sizes))],
        "conv_b": [rnd((num_filters[i],), 0.05) for i in range(len(filter_sizes))],
        "bn": [bn_init(f) for f in num_filters],
        "fc1_w": rnd((hidden, int(sum(num_filters))), 0.1),
        "fc1_b": rnd((hidden,), 0.05),
        "bn_fc": bn_init(hidden),
        "fc2_w": rnd((num_classes, hidden), 0.1),
        "fc2_b": rnd((num_classes,), 0.05),
    }


def ref_forward(x, p):
    B, S, W, V = x.shape
    E = p["emb"].shape[1]
    xe = (x.reshape(-1, V).astype(jnp.float32) @ p["emb"]).reshape(B, S, W * E)
    pooled = []
    for i in range(len(p["conv_w"])):
        w, b, bn = p["conv_w"][i], p["conv_b"][i], p["bn"][i]
        fs = w.shape[2]
        Lout = S - fs + 1
        acc = jnp.zeros((B, Lout, w.shape[0]), jnp.float32)
        for t in range(fs):
            acc = acc + jnp.einsum("blc,fc->blf", xe[:, t:t + Lout, :], w[:, :, t])
        acc = acc + b[None, None, :]
        acc = (acc - bn[2]) * bn[0] / jnp.sqrt(bn[3] + EPS) + bn[1]
        pooled.append(jnp.max(jnp.maximum(acc, 0.0), axis=1))
    feat = jnp.concatenate(pooled, axis=1)
    h = feat @ p["fc1_w"].T + p["fc1_b"]
    bn = p["bn_fc"]
    h = jnp.maximum((h - bn[2]) * bn[0] / jnp.sqrt(bn[3] + EPS) + bn[1], 0.0)
    logits = h @ p["fc2_w"].T + p["fc2_b"]
    return jax.nn.softmax(logits, axis=1)


if __name__ == "__main__":
    B, S, W, V, E = 2, 8, 4, 16, 8            # batch, seq, word_len, vocab, embed_dim
    filter_sizes = [2, 3, 4]
    num_filters = [32, 32, 32]
    num_classes = 2

    key = jax.random.PRNGKey(0)
    kx, kp_key = jax.random.split(key)
    chars = jax.random.randint(kx, (B, S, W), 0, V)
    x = jax.nn.one_hot(chars, V, dtype=jnp.float32)           # (B, S, W, V)

    params = init_params(kp_key, V, E, W, filter_sizes, num_filters, num_classes)
    kparams = prepare_params(params, filter_sizes, W, S)      # one-time, outside forward

    out = jax.block_until_ready(cnn_nlp_forward(x, kparams))
    ref = ref_forward(x, params)

    assert out.shape == (B, num_classes)
    assert bool(jnp.all(jnp.isfinite(out)))
    assert bool(jnp.allclose(out, ref, atol=1e-3, rtol=1e-3)), (out, ref)
    print("KERNEL_OK")
</pallas_src>

<mosaic_0001>
module attributes {stable_mosaic.version = 11 : i64} {
  func.func @_cnn_nlp_kernel(%arg0: memref<16x64xf32, #tpu.memory_space<vmem>>, %arg1: memref<64x32xf32, #tpu.memory_space<vmem>>, %arg2: memref<128x128xf32, #tpu.memory_space<vmem>>, %arg3: memref<1x128xf32, #tpu.memory_space<vmem>>, %arg4: memref<1x8x128xf32, #tpu.memory_space<vmem>>, %arg5: memref<128x128xf32, #tpu.memory_space<vmem>>, %arg6: memref<1x128xf32, #tpu.memory_space<vmem>>, %arg7: memref<128x2xf32, #tpu.memory_space<vmem>>, %arg8: memref<1x2xf32, #tpu.memory_space<vmem>>, %arg9: memref<2x2xf32, #tpu.memory_space<vmem>>) attributes {dimension_semantics = [], scalar_prefetch = 0 : i64, scratch_operands = 0 : i64, tpu.core_type = #tpu.core_type<tc>} {
    %c0 = arith.constant 0 : index
    %c0_0 = arith.constant 0 : index
    %0 = vector.load %arg0[%c0, %c0_0] : memref<16x64xf32, #tpu.memory_space<vmem>>, vector<16x64xf32>
    %c0_1 = arith.constant 0 : index
    %c0_2 = arith.constant 0 : index
    %1 = vector.load %arg1[%c0_1, %c0_2] : memref<64x32xf32, #tpu.memory_space<vmem>>, vector<64x32xf32>
    %cst = arith.constant dense<0.000000e+00> : vector<16x32xf32>
    %2 = tpu.matmul %0, %1, %cst {dimension_numbers = #tpu.dot_dimension_numbers<[1], [0], [0], [1], [0, 0, 1, 1], [], []>} : vector<16x64xf32>, vector<64x32xf32>, vector<16x32xf32> -> vector<16x32xf32>
    %c15_i32 = arith.constant 15 : i32
    %3 = tpu.dynamic_rotate %2 by %c15_i32 dim 0 : vector<16x32xf32>, i32 -> vector<16x32xf32>
    %c14_i32 = arith.constant 14 : i32
    %4 = tpu.dynamic_rotate %2 by %c14_i32 dim 0 : vector<16x32xf32>, i32 -> vector<16x32xf32>
    %c13_i32 = arith.constant 13 : i32
    %5 = tpu.dynamic_rotate %2 by %c13_i32 dim 0 : vector<16x32xf32>, i32 -> vector<16x32xf32>
    %6 = tpu.concatenate %2, %3, %4, %5 in 1 : vector<16x32xf32>, vector<16x32xf32>, vector<16x32xf32>, vector<16x32xf32> -> vector<16x128xf32>
    %c0_3 = arith.constant 0 : index
    %c0_4 = arith.constant 0 : index
    %7 = vector.load %arg2[%c0_3, %c0_4] : memref<128x128xf32, #tpu.memory_space<vmem>>, vector<128x128xf32>
    %cst_5 = arith.constant dense<0.000000e+00> : vector<16x128xf32>
    %8 = tpu.matmul %6, %7, %cst_5 {dimension_numbers = #tpu.dot_dimension_numbers<[1], [0], [0], [1], [0, 0, 1, 1], [], []>} : vector<16x128xf32>, vector<128x128xf32>, vector<16x128xf32> -> vector<16x128xf32>
    %c0_6 = arith.constant 0 : index
    %c0_7 = arith.constant 0 : index
    %9 = vector.load %arg3[%c0_6, %c0_7] : memref<1x128xf32, #tpu.memory_space<vmem>>, vector<1x128xf32>
    %10 = vector.broadcast %9 : vector<1x128xf32> to vector<16x128xf32>
    %11 = arith.addf %8, %10 : vector<16x128xf32>
    %cst_8 = arith.constant 0.000000e+00 : f32
    %12 = vector.broadcast %cst_8 : f32 to vector<16x128xf32>
    %13 = arith.maximumf %11, %12 : vector<16x128xf32>
    %14 = vector.shape_cast %13 : vector<16x128xf32> to vector<2x8x128xf32>
    %c0_9 = arith.constant 0 : index
    %c0_10 = arith.constant 0 : index
    %c0_11 = arith.constant 0 : index
    %15 = vector.load %arg4[%c0_9, %c0_10, %c0_11] : memref<1x8x128xf32, #tpu.memory_space<vmem>>, vector<1x8x128xf32>
    %16 = vector.broadcast %15 : vector<1x8x128xf32> to vector<2x8x128xf32>
    %17 = arith.mulf %14, %16 : vector<2x8x128xf32>
    %cst_12 = arith.constant dense<0xFF800000> : vector<2x128xf32>
    %18 = vector.multi_reduction <maximumf>, %17, %cst_12 [1] : vector<2x8x128xf32> to vector<2x128xf32>
    %c0_13 = arith.constant 0 : index
    %c0_14 = arith.constant 0 : index
    %19 = vector.load %arg5[%c0_13, %c0_14] : memref<128x128xf32, #tpu.memory_space<vmem>>, vector<128x128xf32>
    %cst_15 = arith.constant dense<0.000000e+00> : vector<2x128xf32>
    %20 = tpu.matmul %18, %19, %cst_15 {dimension_numbers = #tpu.dot_dimension_numbers<[1], [0], [0], [1], [0, 0, 1, 1], [], []>} : vector<2x128xf32>, vector<128x128xf32>, vector<2x128xf32> -> vector<2x128xf32>
    %c0_16 = arith.constant 0 : index
    %c0_17 = arith.constant 0 : index
    %21 = vector.load %arg6[%c0_16, %c0_17] : memref<1x128xf32, #tpu.memory_space<vmem>>, vector<1x128xf32>
    %22 = vector.broadcast %21 : vector<1x128xf32> to vector<2x128xf32>
    %23 = arith.addf %20, %22 : vector<2x128xf32>
    %cst_18 = arith.constant 0.000000e+00 : f32
    %24 = vector.broadcast %cst_18 : f32 to vector<2x128xf32>
    %25 = arith.maximumf %23, %24 : vector<2x128xf32>
    %c0_19 = arith.constant 0 : index
    %c0_20 = arith.constant 0 : index
    %26 = vector.load %arg7[%c0_19, %c0_20] : memref<128x2xf32, #tpu.memory_space<vmem>>, vector<128x2xf32>
    %cst_21 = arith.constant dense<0.000000e+00> : vector<2x2xf32>
    %27 = tpu.matmul %25, %26, %cst_21 {dimension_numbers = #tpu.dot_dimension_numbers<[1], [0], [0], [1], [0, 0, 1, 1], [], []>} : vector<2x128xf32>, vector<128x2xf32>, vector<2x2xf32> -> vector<2x2xf32>
    %c0_22 = arith.constant 0 : index
    %c0_23 = arith.constant 0 : index
    %28 = vector.load %arg8[%c0_22, %c0_23] : memref<1x2xf32, #tpu.memory_space<vmem>>, vector<1x2xf32>
    %29 = vector.broadcast %28 : vector<1x2xf32> to vector<2x2xf32>
    %30 = arith.addf %27, %29 : vector<2x2xf32>
    %cst_24 = arith.constant dense<0xFF800000> : vector<2xf32>
    %31 = vector.multi_reduction <maximumf>, %30, %cst_24 [1] : vector<2x2xf32> to vector<2xf32>
    %32 = vector.shape_cast %31 : vector<2xf32> to vector<2x1xf32>
    %33 = vector.broadcast %32 : vector<2x1xf32> to vector<2x2xf32>
    %34 = arith.subf %30, %33 : vector<2x2xf32>
    %35 = math.exp %34 : vector<2x2xf32>
    %cst_25 = arith.constant dense<0.000000e+00> : vector<2xf32>
    %36 = vector.multi_reduction <add>, %35, %cst_25 [1] : vector<2x2xf32> to vector<2xf32>
    %37 = vector.shape_cast %36 : vector<2xf32> to vector<2x1xf32>
    %38 = tpu.reciprocal %37 {approx = true} : vector<2x1xf32> -> vector<2x1xf32>
    %39 = vector.broadcast %38 : vector<2x1xf32> to vector<2x2xf32>
    %40 = arith.mulf %35, %39 : vector<2x2xf32>
    %c0_26 = arith.constant 0 : index
    %c0_27 = arith.constant 0 : index
    %41 = vector.load %arg9[%c0_26, %c0_27] : memref<2x2xf32, #tpu.memory_space<vmem>>, vector<2x2xf32>
    tpu.vector_store %arg9[%c0_26, %c0_27], %40 {strides = array<i32>} : memref<2x2xf32, #tpu.memory_space<vmem>>, vector<2x2xf32>,
    return
  }
}

</mosaic_0001>

<bundles_post_ra>
// kernel: tpu_custom_call.1
= control target key start
LH: loop header
LB: loop body
LE: loop exit
PB: predicated region body
PF: predicated region fallthrough
CT: control target
= control target key end

     0   :  { %14 = vsyncpa [#allocation3], 0  ;;  %s1030_s0 = inlined_call_operand.vmem [shape: f32[16,64], index: 0, kind: input, shape index: {}]   ;;  %s1031_s1 = inlined_call_operand.vmem [shape: f32[64,32], index: 1, kind: input, shape index: {}]   ;;  %s1032_s2 = inlined_call_operand.vmem [shape: f32[128,128], index: 2, kind: input, shape index: {}]   ;;  %s1033_s3 = inlined_call_operand.vmem [shape: f32[1,128], index: 3, kind: input, shape index: {}]   ;;  %s1034_s4 = inlined_call_operand.vmem [shape: f32[1,8,128], index: 4, kind: input, shape index: {}]   ;;  %s1035_s5 = inlined_call_operand.hbm [shape: f32[128,128], index: 5, kind: input, shape index: {}]   ;;  %s1036_s6 = inlined_call_operand.vmem [shape: f32[1,128], index: 6, kind: input, shape index: {}]   ;;  %s1037_s7 = inlined_call_operand.vmem [shape: f32[128,2], index: 7, kind: input, shape index: {}]   ;;  %s1038_s8 = inlined_call_operand.vmem [shape: f32[1,2], index: 8, kind: input, shape index: {}]   ;;  %s1039_s9 = inlined_call_operand.hbm [shape: f32[2,2], index: 9, kind: output, shape index: {}]  }
   0x1   :  { %15 = vsyncpa [#allocation4], 0  ;;  %s786_s30 = smov [#allocation2]  }
   0x2   :  { %s31_s10 = sshll.u32 %s786_s30, 4  ;;  %s32_s10 = int_to_ptr.vmem [resolvable:$true] %s31_s10 }
   0x3   :  { %s750_s11 = scalar_lea.vmem %s32_s10, 2048  ;;  %p755_p1 = scmp.lt.s32.totalorder %s32_s10, %s32_s10 }
   0x4   :  { %p751_p0 = scmp.ne.s32.totalorder %s32_s10, %s750_s11  ;;  %p756_p2 = scmp.lt.s32.totalorder %s750_s11, %s750_s11 }
   0x6   :  { %p757_p3 = por %p756_p2, %p755_p1 }
   0x8   :  { %p758_p4 = pnand %p757_p3, %p751_p0 }
   0xa   :  { %761 = shalt.err (!%p758_p4)
}
   0xb   :  { %s787_s12 = smov 128   ;;  %s788_s13 = smov 8  }
   0xc   :  { %37 = dma.hbm_to_vmem [thread:$0]  %s1035_s5, 2048, %s32_s10, [#allocation3], %s787_s12, %s787_s12, %s788_s13  }
   0xd   :  { %782 = dma.done.wait [#allocation3], 2048  }
   0xe   :  { %783 = vsyncadd [#allocation3], 4294965248  ;;  %v56_v0 = vld [vmem:[%s1031_s1 + $0x38] sm:$0xff]  ;;  %v55_v1 = vld [vmem:[%s1031_s1 + $0x30] sm:$0xff]  ;;  %vm57_vm0 = vcmask 523264   ;;  %v141_v22 = vlaneseq  ;;  %v789_v41 = vmov 0.0  }
   0xf   :  { %590 = vmatprep.subr.mxu0 %v56_v0  ;;  %v54_v2 = vld [vmem:[%s1031_s1 + $0x28] sm:$0xff]  ;;  %v47_v3 = vld [vmem:[%s1030_s0] sm:$0xff]  ;;  %v52_v5 = vld [vmem:[%s1031_s1 + $0x18] sm:$0xff]  ;;  %s791_s20 = smov 32   ;;  %s792_s21 = smov 64   ;;  %vm180_vm4 = vcmask 261120  }
  0x10   :  { %591 = vmatpush3.msra.mxu0 %v56_v0  ;;  %606 = vmatprep.mubr.msk.f32.mxu0 %vm57_vm0, %v47_v3  ;;  %v53_v4 = vld [vmem:[%s1031_s1 + $0x20] sm:$0xff]  ;;  %v51_v6 = vld [vmem:[%s1031_s1 + $0x10] sm:$0xff]  ;;  %v50_v7 = vld [vmem:[%s1031_s1 + $0x8] sm:$0xff]  ;;  %v142_v25 = vshrl.u32 %v141_v22, 7  ;;  %vm185_vm5 = vcmask 785408   ;;  %vm793_vm6 = vmmov 0  }
  0x11   :  { %592 = vmatprep.subr.mxu0 %v55_v1  ;;  %v49_v8 = vld [vmem:[%s1031_s1] sm:$0xff]  ;;  %v48_v9 = vld [vmem:[%s1030_s0 + $0x8] sm:$0xff]  ;;  %v203_v10 = vld [vmem:[%s1032_s2 + $0x78] sm:$0xff]  ;;  %vm328_vm7 = vcmask 1041409   ;;  %vm495_vm8 = vcmask 9216  }
  0x12   :  { %593 = vmatpush3.msra.mxu0 %v55_v1  ;;  %v202_v11 = vld [vmem:[%s1032_s2 + $0x70] sm:$0xff]  ;;  %609 = vmatprep.subr.mxu1 %v203_v10  ;;  %v201_v12 = vld [vmem:[%s1032_s2 + $0x68] sm:$0xff]  ;;  %v200_v13 = vld [vmem:[%s1032_s2 + $0x60] sm:$0xff]  ;;  %vm153_vm1 = vcmp.lt.s32.totalorder %v142_v25, 5  ;;  %vm143_vm2 = vcmp.lt.s32.totalorder %v142_v25, 7  ;;  %vm148_vm3 = vcmp.lt.s32.totalorder %v142_v25, 6 }
  0x13   :  { %594 = vmatprep.subr.mxu0 %v54_v2  ;;  %610 = vmatpush3.msra.mxu1 %v203_v10  ;;  %v199_v14 = vld [vmem:[%s1032_s2 + $0x58] sm:$0xff]  ;;  %v198_v15 = vld [vmem:[%s1032_s2 + $0x50] sm:$0xff]  ;;  %v197_v16 = vld [vmem:[%s1032_s2 + $0x48] sm:$0xff] }
  0x14   :  { %595 = vmatpush3.msra.mxu0 %v54_v2  ;;  %611 = vmatprep.subr.mxu1 %v202_v11  ;;  %v196_v17 = vld [vmem:[%s1032_s2 + $0x40] sm:$0xff]  ;;  %v195_v18 = vld [vmem:[%s1032_s2 + $0x38] sm:$0xff]  ;;  %v194_v19 = vld [vmem:[%s1032_s2 + $0x30] sm:$0xff] }
  0x15   :  { %596 = vmatprep.subr.mxu0 %v53_v4  ;;  %612 = vmatpush3.msra.mxu1 %v202_v11  ;;  %v193_v20 = vld [vmem:[%s1032_s2 + $0x28] sm:$0xff]  ;;  %v192_v21 = vld [vmem:[%s1032_s2 + $0x20] sm:$0xff]  ;;  %v191_v23 = vld [vmem:[%s1032_s2 + $0x18] sm:$0xff] }
  0x16   :  { %597 = vmatpush3.msra.mxu0 %v53_v4  ;;  %613 = vmatprep.subr.mxu1 %v201_v12  ;;  %v190_v24 = vld [vmem:[%s1032_s2 + $0x10] sm:$0xff]  ;;  %v189_v26 = vld [vmem:[%s1032_s2 + $0x8] sm:$0xff]  ;;  %v188_v27 = vld [vmem:[%s1032_s2] sm:$0xff]  ;;  %s790_s2 = smov 96  }
  0x17   :  { %598 = vmatprep.subr.mxu0 %v52_v5  ;;  %614 = vmatpush3.msra.mxu1 %v201_v12  ;;  %v318_v36 = vld [vmem:[#allocation2 + $0x78] sm:$0xff]  ;;  %v317_v44 = vld [vmem:[#allocation2 + $0x70] sm:$0xff]  ;;  %v316_v47 = vld [vmem:[#allocation2 + $0x68] sm:$0xff] }
  0x18   :  { %599 = vmatpush3.msra.mxu0 %v52_v5  ;;  %615 = vmatprep.subr.mxu1 %v200_v13  ;;  %v315_v49 = vld [vmem:[#allocation2 + $0x60] sm:$0xff]  ;;  %v314_v50 = vld [vmem:[#allocation2 + $0x58] sm:$0xff]  ;;  %v313_v2 = vld [vmem:[#allocation2 + $0x50] sm:$0xff] }
  0x19   :  { %600 = vmatprep.subr.mxu0 %v51_v6  ;;  %616 = vmatpush3.msra.mxu1 %v200_v13  ;;  %v312_v3 = vld [vmem:[#allocation2 + $0x48] sm:$0xff]  ;;  %v311_v4 = vld [vmem:[#allocation2 + $0x40] sm:$0xff]  ;;  %v310_v5 = vld [vmem:[#allocation2 + $0x38] sm:$0xff] }
  0x1a   :  { %601 = vmatpush3.msra.mxu0 %v51_v6  ;;  %617 = vmatprep.subr.mxu1 %v199_v14  ;;  %v309_v6 = vld [vmem:[#allocation2 + $0x30] sm:$0xff]  ;;  %v304_v11 = vld [vmem:[#allocation2 + $0x8] sm:$0xff]  ;;  %v303_v12 = vld [vmem:[#allocation2] sm:$0xff] }
  0x1b   :  { %602 = vmatprep.subr.mxu0 %v50_v7  ;;  %618 = vmatpush3.msra.mxu1 %v199_v14  ;;  %v305_v10 = vld [vmem:[#allocation2 + $0x10] sm:$0xff]  ;;  %v417_v13 = vld [vmem:[%s1037_s7 + $0x78] sm:$0xff] }
  0x1c   :  { %603 = vmatpush3.msra.mxu0 %v50_v7  ;;  %619 = vmatprep.subr.mxu1 %v198_v15  ;;  %v308_v7 = vld [vmem:[#allocation2 + $0x28] sm:$0xff]  ;;  %v416_v14 = vld [vmem:[%s1037_s7 + $0x70] sm:$0xff]  ;;  %v405_v25 = vld [vmem:[%s1037_s7 + $0x18] sm:$0xff] }
  0x1d   :  { %604 = vmatprep.subr.mxu0 %v49_v8  ;;  %620 = vmatpush3.msra.mxu1 %v198_v15  ;;  %v415_v15 = vld [vmem:[%s1037_s7 + $0x68] sm:$0xff]  ;;  %v408_v22 = vld [vmem:[%s1037_s7 + $0x30] sm:$0xff] }
  0x1e   :  { %605 = vmatpush3.msra.mxu0 %v49_v8  ;;  %621 = vmatprep.subr.mxu1 %v197_v16  ;;  %v307_v8 = vld [vmem:[#allocation2 + $0x20] sm:$0xff] }
  0x1f   :  { %607 = vmatmul.mubr.msk.f32.vlgmr.msra.gmra.mxu0 %vm57_vm0, %v48_v9  ;;  %622 = vmatpush3.msra.mxu1 %v197_v16  ;;  %v306_v9 = vld [vmem:[#allocation2 + $0x18] sm:$0xff]  ;;  %v414_v16 = vld [vmem:[%s1037_s7 + $0x60] sm:$0xff] }
  0x20   :  { %623 = vmatprep.subr.mxu1 %v196_v17  ;;  %644 = vmatprep.subr.mxu0 %v789_v41 }
  0x21   :  { %624 = vmatpush3.msra.mxu1 %v196_v17  ;;  %645 = vmatpush3.msra.mxu0 %v318_v36  ;;  %v413_v17 = vld [vmem:[%s1037_s7 + $0x58] sm:$0xff] }
  0x22   :  { %625 = vmatprep.subr.mxu1 %v195_v18  ;;  %646 = vmatprep.subr.mxu0 %v789_v41 }
  0x23   :  { %626 = vmatpush3.msra.mxu1 %v195_v18  ;;  %647 = vmatpush3.msra.mxu0 %v317_v44  ;;  %v412_v18 = vld [vmem:[%s1037_s7 + $0x50] sm:$0xff] }
  0x24   :  { %627 = vmatprep.subr.mxu1 %v194_v19  ;;  %648 = vmatprep.subr.mxu0 %v789_v41 }
  0x25   :  { %628 = vmatpush3.msra.mxu1 %v194_v19  ;;  %649 = vmatpush3.msra.mxu0 %v316_v47  ;;  %v411_v19 = vld [vmem:[%s1037_s7 + $0x48] sm:$0xff] }
  0x26   :  { %629 = vmatprep.subr.mxu1 %v193_v20  ;;  %650 = vmatprep.subr.mxu0 %v789_v41 }
  0x27   :  { %630 = vmatpush3.msra.mxu1 %v193_v20  ;;  %651 = vmatpush3.msra.mxu0 %v315_v49  ;;  %v410_v20 = vld [vmem:[%s1037_s7 + $0x40] sm:$0xff] }
  0x28   :  { %631 = vmatprep.subr.mxu1 %v192_v21  ;;  %652 = vmatprep.subr.mxu0 %v789_v41 }
  0x29   :  { %632 = vmatpush3.msra.mxu1 %v192_v21  ;;  %653 = vmatpush3.msra.mxu0 %v314_v50  ;;  %v409_v21 = vld [vmem:[%s1037_s7 + $0x38] sm:$0xff]  ;;  %v404_v50 = vld [vmem:[%s1037_s7 + $0x10] sm:$0xff] }
  0x2a   :  { %633 = vmatprep.subr.mxu1 %v191_v23  ;;  %654 = vmatprep.subr.mxu0 %v789_v41 }
  0x2b   :  { %634 = vmatpush3.msra.mxu1 %v191_v23  ;;  %655 = vmatpush3.msra.mxu0 %v313_v2  ;;  %v407_v23 = vld [vmem:[%s1037_s7 + $0x28] sm:$0xff] }
  0x2c   :  { %635 = vmatprep.subr.mxu1 %v190_v24  ;;  %656 = vmatprep.subr.mxu0 %v789_v41 }
  0x2d   :  { %636 = vmatpush3.msra.mxu1 %v190_v24  ;;  %657 = vmatpush3.msra.mxu0 %v312_v3  ;;  %v406_v24 = vld [vmem:[%s1037_s7 + $0x20] sm:$0xff] }
  0x2e   :  { %637 = vmatprep.subr.mxu1 %v189_v26  ;;  %658 = vmatprep.subr.mxu0 %v789_v41 }
  0x2f   :  { %638 = vmatpush3.msra.mxu1 %v189_v26  ;;  %659 = vmatpush3.msra.mxu0 %v311_v4  ;;  %v525_v26 = vld [vmem:[%s1033_s3] ss:$0 sm:$0xff] }
  0x30   :  { %639 = vmatprep.subr.mxu1 %v188_v27  ;;  %660 = vmatprep.subr.mxu0 %v789_v41 }
  0x31   :  { %640 = vmatpush3.msra.mxu1 %v188_v27  ;;  %661 = vmatpush3.msra.mxu0 %v310_v5 }
  0x32   :  { %679 = vmatprep.subr.mxu1 %v789_v41  ;;  %662 = vmatprep.subr.mxu0 %v789_v41 }
  0x33   :  { %663 = vmatpush3.msra.mxu0 %v309_v6  ;;  %676 = vmatprep.mubr.msk.f32.mxu0 %vm793_vm6, %v789_v41 }
  0x34   :  { %664 = vmatprep.subr.mxu0 %v789_v41 }
  0x35   :  { %665 = vmatpush3.msra.mxu0 %v308_v7 }
  0x36   :  { %666 = vmatprep.subr.mxu0 %v789_v41 }
  0x37   :  { %667 = vmatpush3.msra.mxu0 %v307_v8 }
  0x38   :  { %668 = vmatprep.subr.mxu0 %v789_v41 }
  0x39   :  { %669 = vmatpush3.msra.mxu0 %v306_v9 }
  0x3a   :  { %670 = vmatprep.subr.mxu0 %v789_v41 }
  0x3b   :  { %671 = vmatpush3.msra.mxu0 %v305_v10 }
  0x3c   :  { %672 = vmatprep.subr.mxu0 %v789_v41 }
  0x3d   :  { %673 = vmatpush3.msra.mxu0 %v304_v11 }
  0x3e   :  { %674 = vmatprep.subr.mxu0 %v789_v41 }
  0x3f   :  { %675 = vmatpush3.msra.mxu0 %v303_v12 }
  0xdf   :  { %v608_v28 = vpop.f32.mrf.mxu0 }
  0xe0   :  { %v140_v29 = vrot.slane %v608_v28, 1  ;;  %v152_v31 = vrot.slane %v608_v28, 3  ;;  %v147_v35 = vrot.slane %v608_v28, 2 }
  0xe1   :  { %v130_v30 = vpop.f32.mrf.mxu0 }
  0xe2   :  { %v139_v32 = vrot.slane %v130_v30, 1  ;;  %v146_v33 = vrot.slane %v130_v30, 2  ;;  %v151_v34 = vrot.slane %v130_v30, 3 }
  0xe4   :  { %v154_v37 = vsel %vm153_vm1, %v151_v34, %v152_v31  ;;  %v155_v38 = vsel %vm153_vm1, %v152_v31, %v151_v34  ;;  %v144_v39 = vsel %vm143_vm2, %v139_v32, %v140_v29  ;;  %v145_v40 = vsel %vm143_vm2, %v140_v29, %v139_v32  ;;  %v288_v29 = vld [vmem:[%s1034_s4] sm:$0xff] }
  0xe5   :  { %v733_v42 = vpack.i.bf16 %v155_v38, %v154_v37  ;;  %v723_v43 = vpack.i.bf16 %v145_v40, %v144_v39  ;;  %v149_v45 = vsel %vm148_vm3, %v146_v33, %v147_v35  ;;  %v150_v46 = vsel %vm148_vm3, %v147_v35, %v146_v33 }
  0xe6   :  { %v728_v48 = vpack.i.bf16 %v150_v46, %v149_v45 }
  0xe7   :  { %734 = vrot.lane.b32.xlu1 %v733_v42, %s790_s2  ;;  %724 = vrot.lane.b32.xlu0 %v723_v43, %s791_s20 }
  0xeb   :  { %729 = vrot.lane.b32.xlu0 %v728_v48, %s792_s21 }
 0x159   :  { %v725_v51 = vpop.permute.xlu0 %724  ;;  %v735_v54 = vpop.permute.xlu1 %734 }
 0x15a   :  { %v727_v52 = vunpack.i.h.bf16 %v725_v51  ;;  %v726_v53 = vunpack.i.l.bf16 %v725_v51  ;;  %v737_v58 = vunpack.i.h.bf16 %v735_v54  ;;  %v736_v59 = vunpack.i.l.bf16 %v735_v54  ;;  %v403_v51 = vld [vmem:[%s1037_s7 + $0x8] sm:$0xff] }
 0x15c   :  { %v181_v60 = vsel %vm180_vm4, %v130_v30, %v726_v53  ;;  %v182_v61 = vsel %vm180_vm4, %v608_v28, %v727_v52  ;;  %v402_v52 = vld [vmem:[%s1037_s7] sm:$0xff] }
 0x15d   :  { %v730_v55 = vpop.permute.xlu0 %729  ;;  %v526_v53 = vld [vmem:[%s1036_s6] ss:$0 sm:$0xff]  ;;  %s794_s6 = smov [#allocation5]  }
 0x15e   :  { %v732_v56 = vunpack.i.h.bf16 %v730_v55  ;;  %v731_v57 = vunpack.i.l.bf16 %v730_v55  ;;  %s514_s7 = sshll.u32 %s794_s6, 4  ;;  %s515_s7 = int_to_ptr.vmem [resolvable:$true] %s514_s7 }
 0x15f   :  { %p767_p6 = scmp.lt.s32.totalorder %s515_s7, %s515_s7 }
 0x160   :  { %v183_v62 = vsel %vm57_vm0, %v181_v60, %v731_v57  ;;  %v184_v63 = vsel %vm57_vm0, %v182_v61, %v732_v56 }
 0x161   :  { %v186_v0 = vsel %vm185_vm5, %v183_v62, %v736_v59  ;;  %v187_v1 = vsel %vm185_vm5, %v184_v63, %v737_v58  ;;  %v527_v58 = vld [vmem:[%s1038_s8] ss:$0 sm:$0xff]  ;;  %s762_s8 = scalar_lea.vmem %s515_s7, 32 }
 0x162   :  { %641 = vmatprep.mubr.f32.mxu1 %v186_v0  ;;  %p763_p5 = scmp.ne.s32.totalorder %s515_s7, %s762_s8  ;;  %p768_p7 = scmp.lt.s32.totalorder %s762_s8, %s762_s8 }
 0x163   :  { %642 = vmatmul.mubr.f32.vlgmr.msra.gmra.mxu1 %v187_v1 }
 0x164   :  { %711 = vmatprep.mubr.msk.f32.mxu1 %vm793_vm6, %v789_v41  ;;  %680 = vmatpush3.msra.mxu1 %v417_v13  ;;  %p769_p8 = por %p768_p7, %p767_p6 }
 0x165   :  { %681 = vmatprep.subr.mxu1 %v789_v41 }
 0x166   :  { %682 = vmatpush3.msra.mxu1 %v416_v14  ;;  %p770_p9 = pnand %p769_p8, %p763_p5 }
 0x167   :  { %683 = vmatprep.subr.mxu1 %v789_v41 }
 0x168   :  { %684 = vmatpush3.msra.mxu1 %v415_v15 }
 0x169   :  { %685 = vmatprep.subr.mxu1 %v789_v41 }
 0x16a   :  { %686 = vmatpush3.msra.mxu1 %v414_v16 }
 0x16b   :  { %687 = vmatprep.subr.mxu1 %v789_v41 }
 0x16c   :  { %688 = vmatpush3.msra.mxu1 %v413_v17 }
 0x16d   :  { %689 = vmatprep.subr.mxu1 %v789_v41 }
 0x16e   :  { %690 = vmatpush3.msra.mxu1 %v412_v18 }
 0x16f   :  { %691 = vmatprep.subr.mxu1 %v789_v41 }
 0x170   :  { %692 = vmatpush3.msra.mxu1 %v411_v19 }
 0x171   :  { %693 = vmatprep.subr.mxu1 %v789_v41 }
 0x172   :  { %694 = vmatpush3.msra.mxu1 %v410_v20 }
 0x173   :  { %695 = vmatprep.subr.mxu1 %v789_v41 }
 0x174   :  { %696 = vmatpush3.msra.mxu1 %v409_v21 }
 0x175   :  { %697 = vmatprep.subr.mxu1 %v789_v41 }
 0x176   :  { %698 = vmatpush3.msra.mxu1 %v408_v22 }
 0x177   :  { %699 = vmatprep.subr.mxu1 %v789_v41 }
 0x178   :  { %700 = vmatpush3.msra.mxu1 %v407_v23 }
 0x179   :  { %701 = vmatprep.subr.mxu1 %v789_v41 }
 0x17a   :  { %702 = vmatpush3.msra.mxu1 %v406_v24 }
 0x17b   :  { %703 = vmatprep.subr.mxu1 %v789_v41 }
 0x17c   :  { %704 = vmatpush3.msra.mxu1 %v405_v25 }
 0x17d   :  { %705 = vmatprep.subr.mxu1 %v789_v41 }
 0x17e   :  { %706 = vmatpush3.msra.mxu1 %v404_v50 }
 0x17f   :  { %707 = vmatprep.subr.mxu1 %v789_v41 }
 0x180   :  { %708 = vmatpush3.msra.mxu1 %v403_v51 }
 0x181   :  { %709 = vmatprep.subr.mxu1 %v789_v41 }
 0x182   :  { %710 = vmatpush3.msra.mxu1 %v402_v52 }
 0x223   :  { %v643_v27 = vpop.f32.mrf.mxu1 }
 0x224   :  { %v283_v28 = vadd.f32 %v643_v27, %v525_v26 }
 0x225   :  { %v277_v30 = vpop.f32.mrf.mxu1 }
 0x226   :  { %v287_v31 = vmax.f32 %v283_v28, 0.0  ;;  %v278_v32 = vadd.f32 %v525_v26, %v277_v30 }
 0x228   :  { %v290_v33 = vmul.f32 %v288_v29, %v287_v31  ;;  %v286_v34 = vmax.f32 %v278_v32, 0.0 }
 0x22a   :  { %v297_v35 = vrot.slane %v290_v33, 4  ;;  %v289_v36 = vmul.f32 %v288_v29, %v286_v34 }
 0x22c   :  { %v298_v37 = vmax.f32 %v290_v33, %v297_v35  ;;  %v291_v38 = vrot.slane %v289_v36, 4 }
 0x22e   :  { %v299_v39 = vrot.slane %v298_v37, 2  ;;  %v292_v40 = vmax.f32 %v289_v36, %v291_v38 }
 0x230   :  { %v300_v42 = vmax.f32 %v298_v37, %v299_v39  ;;  %v293_v43 = vrot.slane %v292_v40, 2 }
 0x232   :  { %v301_v44 = vrot.slane %v300_v42, 1  ;;  %v294_v45 = vmax.f32 %v292_v40, %v293_v43 }
 0x234   :  { %v295_v46 = vrot.slane %v294_v45, 1  ;;  %v302_v48 = vmax.f32 %v300_v42, %v301_v44 }
 0x236   :  { %v296_v47 = vmax.f32 %v294_v45, %v295_v46 }
 0x238   :  { %v329_v49 = vsel %vm328_vm7, %v302_v48, %v296_v47 }
 0x239   :  { %677 = vmatmul.mubr.f32.vlgmr.msra.gmra.mxu0 %v329_v49 }
 0x2f9   :  { %v397_v54 = vpop.f32.mrf.mxu0 }
 0x2fa   :  { %v398_v55 = vadd.f32 %v526_v53, %v397_v54 }
 0x2fb   :  { %v678_v56 = vpop.f32.mrf.mxu0 }
 0x2fc   :  { %v401_v57 = vmax.f32 %v398_v55, 0.0 }
 0x2fe   :  { %712 = vmatmul.mubr.f32.vlgmr.msra.gmra.mxu1 %v401_v57 }
 0x3be   :  { %v491_v59 = vpop.f32.mrf.mxu1 }
 0x3bf   :  { %v492_v60 = vadd.f32 %v527_v58, %v491_v59 }
 0x3c0   :  { %v713_v61 = vpop.f32.mrf.mxu1 }
 0x3c1   :  { %v496_v41 = vsel %vm495_vm8, %v492_v60, -inf }
 0x3c2   :  { %497 = vmax.xlane.f32.xlu1 %v496_v41 }
 0x44b   :  { %v498_v62 = vpop.xlane.xlu1 %497 }
 0x44c   :  { %v499_v63 = vsub.f32 %v492_v60, %v498_v62 }
 0x44e   :  { %v500_v0 = vmul.f32 1.442695, %v499_v63 }
 0x450   :  { %738 = vpow2.f32 %v500_v0 }
 0x45d   :  { %v739_v1 = vpop.eup %738 }
 0x45e   :  { %v502_v2 = vsel %vm495_vm8, %v739_v1, 0.0 }
 0x45f   :  { %503 = vadd.xlane.f32.xlu0 %v502_v2 }
 0x4e8   :  { %v504_v3 = vpop.xlane.xlu0 %503 }
 0x4e9   :  { %740 = vrcp.f32 %v504_v3 }
 0x4f6   :  { %v741_v4 = vpop.eup %740 }
 0x4f7   :  { %v506_v5 = vmul.f32 %v741_v4, %v739_v1 }
 0x4f9   :  { %507 = vst.msk [vmem:[#allocation5] sm:$0x3] %vm495_vm8, %v506_v5 }
 0x4fa   :  { %773 = shalt.err (!%p770_p9)
}
 0x4fb   :  { %517 = dma.vmem_to_hbm [thread:$0]  %s515_s7, 32, %s1039_s9, [#allocation4]  }
 0x4fc   :  { %784 = dma.done.wait [#allocation4], 32  }
 0x4fd   :  { %785 = vsyncadd [#allocation4], 4294967264 }
 0x4fe   :  { %521 = vsyncpa [#allocation3], 1 }
 0x4ff   :  { %522 = vsyncpa [#allocation4], 1 }

</bundles_post_ra>
